<compile_context>
chip_gen: v5e
topology: v5e:2x2
jax: 0.10.0
libtpu: 0.0.40
codegen_flags: <defaults>
</compile_context>

<pallas_src>
import functools

import jax
import jax.numpy as jnp
from jax.experimental import pallas as pl
from jax.experimental.pallas import tpu as pltpu

OUT_LANES = 128  # lane-dense packed output width (value | grad | zero padding)


# ----------------------------------------------------------------------------
# Kernel
# ----------------------------------------------------------------------------
def _mtl_kernel(x_ref, wa_ref, wb_ref, wc_ref, wd_ref, b_ref, out_ref, *, width):
    """Fused two-branch MLP forward on one (tile_b, IN) batch tile."""
    f32 = jnp.float32
    H = wb_ref.shape[0]  # padded fused hidden width (multiple of 128)

    x = x_ref[...]

    # Hoist bias loads once (full-lane rows of the packed bias tile).
    b_a = b_ref[0:1, :]            # [b1 | b5 | 0]
    b_b = b_ref[1:2, :]            # [b2 | b2 | 0]
    b_c = b_ref[2:3, :]            # [b3 | b6 | 0]
    b_d = b_ref[3:4, :OUT_LANES]   # [b4 | b7 | 0]

    # Layer 1: fc1 || fc5 (shared input) + relu, then x^4 on both lane halves
    # (mult1*mult2 on branch 1, mult4*mult5 on branch 2). Pad lanes stay 0.
    h = jnp.maximum(jnp.dot(x, wa_ref[...], preferred_element_type=f32) + b_a, 0.0)
    h = h * h
    h = h * h

    # Layer 2: shared fc2 on both branches via blockdiag(w2, w2) + relu2.
    h = jnp.maximum(jnp.dot(h, wb_ref[...], preferred_element_type=f32) + b_b, 0.0)

    # mult3 squares only branch 1 (lanes [0:width]); branch 2 passes through.
    lane = jax.lax.broadcasted_iota(jnp.int32, (1, H), 1)
    h = h * jnp.where(lane < width, h, jnp.float32(1.0))

    # Layer 3: fc3 (branch 1) || fc6 (branch 2) via blockdiag(w3, w6) + relu.
    h = jnp.maximum(jnp.dot(h, wc_ref[...], preferred_element_type=f32) + b_c, 0.0)

    # Layer 4: fc4 || fc7 -> single lane-dense (tile_b, 128) unmasked store.
    out_ref[...] = jnp.dot(h, wd_ref[...], preferred_element_type=f32) + b_d


# ----------------------------------------------------------------------------
# Wrapper / parameter packing
# ----------------------------------------------------------------------------
def _round_up(n, m):
    return ((n + m - 1) // m) * m


def pack_params(p, out1, out2):
    """Pack the 14 per-layer tensors into 5 lane-aligned operands."""
    width = p["w2"].shape[0]
    in_dim = p["w1"].shape[0]
    H = _round_up(max(2 * width, OUT_LANES), 128)
    assert out1 + out2 <= OUT_LANES

    wa = jnp.zeros((in_dim, H), jnp.float32)                 # fc1 || fc5
    wa = wa.at[:, :width].set(p["w1"])
    wa = wa.at[:, width:2 * width].set(p["w5"])

    wb = jnp.zeros((H, H), jnp.float32)                      # blockdiag(fc2, fc2)
    wb = wb.at[:width, :width].set(p["w2"])
    wb = wb.at[width:2 * width, width:2 * width].set(p["w2"])

    wc = jnp.zeros((H, H), jnp.float32)                      # blockdiag(fc3, fc6)
    wc = wc.at[:width, :width].set(p["w3"])
    wc = wc.at[width:2 * width, width:2 * width].set(p["w6"])

    wd = jnp.zeros((H, OUT_LANES), jnp.float32)              # fc4 || fc7
    wd = wd.at[:width, :out1].set(p["w4"])
    wd = wd.at[width:2 * width, out1:out1 + out2].set(p["w7"])

    biases = jnp.zeros((8, H), jnp.float32)                  # one bias tile
    biases = biases.at[0, :width].set(p["b1"][0])
    biases = biases.at[0, width:2 * width].set(p["b5"][0])
    biases = biases.at[1, :width].set(p["b2"][0])
    biases = biases.at[1, width:2 * width].set(p["b2"][0])
    biases = biases.at[2, :width].set(p["b3"][0])
    biases = biases.at[2, width:2 * width].set(p["b6"][0])
    biases = biases.at[3, :out1].set(p["b4"][0])
    biases = biases.at[3, out1:out1 + out2].set(p["b7"][0])
    return wa, wb, wc, wd, biases, H, width


def mtl_forward(x, params, tile_b=256):
    """params: dict with 'w1'..'w7' pre-transposed to (in, out) and 'b1'..'b7' (1, out)."""
    batch, in_dim = x.shape
    out1 = params["w4"].shape[1]
    out2 = params["w7"].shape[1]

    wa, wb, wc, wd, biases, H, width = pack_params(params, out1, out2)

    # Batch tiling: multiple of 8 sublanes, padded batch, "parallel" grid axis.
    tile_b = min(tile_b, _round_up(batch, 8))
    padded = _round_up(batch, tile_b)
    if padded != batch:
        x = jnp.pad(x, ((0, padded - batch), (0, 0)))
    grid = (padded // tile_b,)

    const = lambda i: (0, 0)  # weights/biases stay resident in VMEM
    out = pl.pallas_call(
        functools.partial(_mtl_kernel, width=width),
        out_shape=jax.ShapeDtypeStruct((padded, OUT_LANES), jnp.float32),
        grid=grid,
        in_specs=[
            pl.BlockSpec((tile_b, in_dim), lambda i: (i, 0)),     # x tile
            pl.BlockSpec((in_dim, H), const),                     # wa
            pl.BlockSpec((H, H), const),                          # wb
            pl.BlockSpec((H, H), const),                          # wc
            pl.BlockSpec((H, OUT_LANES), const),                  # wd
            pl.BlockSpec((8, H), const),                          # biases
        ],
        out_specs=pl.BlockSpec((tile_b, OUT_LANES), lambda i: (i, 0)),
        compiler_params=pltpu.CompilerParams(
            dimension_semantics=("parallel",)),
    )(x, wa, wb, wc, wd, biases)

    value = out[:batch, :out1]
    grad = out[:batch, out1:out1 + out2]
    return value, grad


# ----------------------------------------------------------------------------
# Init + pure-JAX reference (for correctness check)
# ----------------------------------------------------------------------------
def _xavier_normal(key, fan_in, fan_out):
    std = (2.0 / (fan_in + fan_out)) ** 0.5
    # PyTorch weight is (out, in); return pre-transposed (in, out) for the kernel.
    return std * jax.random.normal(key, (fan_in, fan_out), dtype=jnp.float32)


def _bias(key, fan_in, fan_out):
    # PyTorch Linear default bias init: U(-1/sqrt(fan_in), 1/sqrt(fan_in)).
    bound = 1.0 / (fan_in ** 0.5)
    return jax.random.uniform(key, (1, fan_out), dtype=jnp.float32,
                              minval=-bound, maxval=bound)


def init_params(key, input_dim, output1_dim, output2_dim, width):
    dims = {
        1: (input_dim, width),
        2: (width, width),
        3: (width, width),
        4: (width, output1_dim),
        5: (input_dim, width),
        6: (width, width),
        7: (width, output2_dim),
    }
    params = {}
    keys = jax.random.split(key, 14)
    for i in range(1, 8):
        fan_in, fan_out = dims[i]
        params[f"w{i}"] = _xavier_normal(keys[2 * (i - 1)], fan_in, fan_out)
        params[f"b{i}"] = _bias(keys[2 * (i - 1) + 1], fan_in, fan_out)
    return params


def reference_forward(x, p):
    """Pure-JAX reference mirroring the PyTorch forward."""
    def lin(h, i):
        return h @ p[f"w{i}"] + p[f"b{i}"]
    h1 = jnp.maximum(lin(x, 1), 0.0)
    h1 = (h1 * h1) * (h1 * h1)
    h1 = jnp.maximum(lin(h1, 2), 0.0)
    h1 = h1 * h1
    h1 = jnp.maximum(lin(h1, 3), 0.0)
    value = lin(h1, 4)
    h2 = jnp.maximum(lin(x, 5), 0.0)
    h2 = (h2 * h2) * (h2 * h2)
    h2 = jnp.maximum(lin(h2, 2), 0.0)
    h2 = jnp.maximum(lin(h2, 6), 0.0)
    grad = lin(h2, 7)
    return value, grad


if __name__ == "__main__":
    INPUT_DIM, OUTPUT1_DIM, OUTPUT2_DIM, WIDTH = 16, 4, 4, 32
    BATCH = 8

    key = jax.random.PRNGKey(0)
    k_params, k_x = jax.random.split(key)
    params = init_params(k_params, INPUT_DIM, OUTPUT1_DIM, OUTPUT2_DIM, WIDTH)

    fwd = jax.jit(mtl_forward, static_argnames=("tile_b",))

    # Small single-tile batch.
    x = jax.random.normal(k_x, (BATCH, INPUT_DIM), dtype=jnp.float32)
    value, grad = jax.block_until_ready(fwd(x, params))
    v_ref, g_ref = reference_forward(x, params)
    assert value.shape == (BATCH, OUTPUT1_DIM) and grad.shape == (BATCH, OUTPUT2_DIM)
    assert jnp.allclose(value, v_ref, atol=1e-4, rtol=1e-5)
    assert jnp.allclose(grad, g_ref, atol=1e-4, rtol=1e-5)

    # Multi-tile batch (exercises grid iteration + batch padding).
    x2 = jax.random.normal(jax.random.PRNGKey(1), (300, INPUT_DIM), dtype=jnp.float32)
    v2, g2 = jax.block_until_ready(fwd(x2, params, tile_b=128))
    v2_ref, g2_ref = reference_forward(x2, params)
    assert jnp.allclose(v2, v2_ref, atol=1e-4, rtol=1e-5)
    assert jnp.allclose(g2, g2_ref, atol=1e-4, rtol=1e-5)

    # TODO(synk): at these tiny dims the Pallas win over jit(reference_forward)
    # only materializes for large batches.
    print("KERNEL_OK")
</pallas_src>

<mosaic_0001>
module attributes {stable_mosaic.version = 11 : i64} {
  func.func @_mtl_kernel(%arg0: i32, %arg1: memref<8x16xf32, #tpu.memory_space<vmem>>, %arg2: memref<16x128xf32, #tpu.memory_space<vmem>>, %arg3: memref<128x128xf32, #tpu.memory_space<vmem>>, %arg4: memref<128x128xf32, #tpu.memory_space<vmem>>, %arg5: memref<128x128xf32, #tpu.memory_space<vmem>>, %arg6: memref<8x128xf32, #tpu.memory_space<vmem>>, %arg7: memref<8x128xf32, #tpu.memory_space<vmem>>) attributes {dimension_semantics = [#tpu.dimension_semantics<parallel>], iteration_bounds = array<i64: 1>, scalar_prefetch = 0 : i64, scratch_operands = 0 : i64, tpu.core_type = #tpu.core_type<tc>, window_params = [{transform_indices = @transform_0, window_bounds = array<i64: 8, 16>}, {pipeline_mode = #tpu.pipeline_mode<synchronous>, transform_indices = @transform_1, window_bounds = array<i64: 16, 128>}, {pipeline_mode = #tpu.pipeline_mode<synchronous>, transform_indices = @transform_2, window_bounds = array<i64: 128, 128>}, {pipeline_mode = #tpu.pipeline_mode<synchronous>, transform_indices = @transform_3, window_bounds = array<i64: 128, 128>}, {pipeline_mode = #tpu.pipeline_mode<synchronous>, transform_indices = @transform_4, window_bounds = array<i64: 128, 128>}, {pipeline_mode = #tpu.pipeline_mode<synchronous>, transform_indices = @transform_5, window_bounds = array<i64: 8, 128>}, {transform_indices = @transform_6, window_bounds = array<i64: 8, 128>}]} {
    %c0 = arith.constant 0 : index
    %c0_0 = arith.constant 0 : index
    %0 = vector.load %arg1[%c0, %c0_0] : memref<8x16xf32, #tpu.memory_space<vmem>>, vector<8x16xf32>
    %c0_1 = arith.constant 0 : index
    %c0_2 = arith.constant 0 : index
    %1 = vector.load %arg6[%c0_1, %c0_2] : memref<8x128xf32, #tpu.memory_space<vmem>>, vector<1x128xf32>
    %c1 = arith.constant 1 : index
    %c0_3 = arith.constant 0 : index
    %2 = vector.load %arg6[%c1, %c0_3] : memref<8x128xf32, #tpu.memory_space<vmem>>, vector<1x128xf32>
    %c2 = arith.constant 2 : index
    %c0_4 = arith.constant 0 : index
    %3 = vector.load %arg6[%c2, %c0_4] : memref<8x128xf32, #tpu.memory_space<vmem>>, vector<1x128xf32>
    %c3 = arith.constant 3 : index
    %c0_5 = arith.constant 0 : index
    %4 = vector.load %arg6[%c3, %c0_5] : memref<8x128xf32, #tpu.memory_space<vmem>>, vector<1x128xf32>
    %c0_6 = arith.constant 0 : index
    %c0_7 = arith.constant 0 : index
    %5 = vector.load %arg2[%c0_6, %c0_7] : memref<16x128xf32, #tpu.memory_space<vmem>>, vector<16x128xf32>
    %cst = arith.constant dense<0.000000e+00> : vector<8x128xf32>
    %6 = tpu.matmul %0, %5, %cst {dimension_numbers = #tpu.dot_dimension_numbers<[1], [0], [0], [1], [0, 0, 1, 1], [], []>} : vector<8x16xf32>, vector<16x128xf32>, vector<8x128xf32> -> vector<8x128xf32>
    %7 = vector.broadcast %1 : vector<1x128xf32> to vector<8x128xf32>
    %8 = arith.addf %6, %7 : vector<8x128xf32>
    %cst_8 = arith.constant 0.000000e+00 : f32
    %9 = vector.broadcast %cst_8 : f32 to vector<8x128xf32>
    %10 = arith.maximumf %8, %9 : vector<8x128xf32>
    %11 = arith.mulf %10, %10 : vector<8x128xf32>
    %12 = arith.mulf %11, %11 : vector<8x128xf32>
    %c0_9 = arith.constant 0 : index
    %c0_10 = arith.constant 0 : index
    %13 = vector.load %arg3[%c0_9, %c0_10] : memref<128x128xf32, #tpu.memory_space<vmem>>, vector<128x128xf32>
    %cst_11 = arith.constant dense<0.000000e+00> : vector<8x128xf32>
    %14 = tpu.matmul %12, %13, %cst_11 {dimension_numbers = #tpu.dot_dimension_numbers<[1], [0], [0], [1], [0, 0, 1, 1], [], []>} : vector<8x128xf32>, vector<128x128xf32>, vector<8x128xf32> -> vector<8x128xf32>
    %15 = vector.broadcast %2 : vector<1x128xf32> to vector<8x128xf32>
    %16 = arith.addf %14, %15 : vector<8x128xf32>
    %cst_12 = arith.constant 0.000000e+00 : f32
    %17 = vector.broadcast %cst_12 : f32 to vector<8x128xf32>
    %18 = arith.maximumf %16, %17 : vector<8x128xf32>
    %19 = tpu.iota {dimensions = array<i32: 1>} : vector<1x128xi32>
    %c32_i32 = arith.constant 32 : i32
    %20 = vector.broadcast %c32_i32 : i32 to vector<1x128xi32>
    %21 = arith.cmpi slt, %19, %20 : vector<1x128xi32>
    %cst_13 = arith.constant 1.000000e+00 : f32
    %22 = vector.shape_cast %21 : vector<1x128xi1> to vector<1x128xi1>
    %23 = vector.broadcast %22 : vector<1x128xi1> to vector<8x128xi1>
    %24 = vector.broadcast %cst_13 : f32 to vector<8x128xf32>
    %25 = arith.select %23, %18, %24 : vector<8x128xi1>, vector<8x128xf32>
    %26 = arith.mulf %18, %25 : vector<8x128xf32>
    %c0_14 = arith.constant 0 : index
    %c0_15 = arith.constant 0 : index
    %27 = vector.load %arg4[%c0_14, %c0_15] : memref<128x128xf32, #tpu.memory_space<vmem>>, vector<128x128xf32>
    %cst_16 = arith.constant dense<0.000000e+00> : vector<8x128xf32>
    %28 = tpu.matmul %26, %27, %cst_16 {dimension_numbers = #tpu.dot_dimension_numbers<[1], [0], [0], [1], [0, 0, 1, 1], [], []>} : vector<8x128xf32>, vector<128x128xf32>, vector<8x128xf32> -> vector<8x128xf32>
    %29 = vector.broadcast %3 : vector<1x128xf32> to vector<8x128xf32>
    %30 = arith.addf %28, %29 : vector<8x128xf32>
    %cst_17 = arith.constant 0.000000e+00 : f32
    %31 = vector.broadcast %cst_17 : f32 to vector<8x128xf32>
    %32 = arith.maximumf %30, %31 : vector<8x128xf32>
    %c0_18 = arith.constant 0 : index
    %c0_19 = arith.constant 0 : index
    %33 = vector.load %arg5[%c0_18, %c0_19] : memref<128x128xf32, #tpu.memory_space<vmem>>, vector<128x128xf32>
    %cst_20 = arith.constant dense<0.000000e+00> : vector<8x128xf32>
    %34 = tpu.matmul %32, %33, %cst_20 {dimension_numbers = #tpu.dot_dimension_numbers<[1], [0], [0], [1], [0, 0, 1, 1], [], []>} : vector<8x128xf32>, vector<128x128xf32>, vector<8x128xf32> -> vector<8x128xf32>
    %35 = vector.broadcast %4 : vector<1x128xf32> to vector<8x128xf32>
    %36 = arith.addf %34, %35 : vector<8x128xf32>
    %c0_21 = arith.constant 0 : index
    %c0_22 = arith.constant 0 : index
    %37 = vector.load %arg7[%c0_21, %c0_22] : memref<8x128xf32, #tpu.memory_space<vmem>>, vector<8x128xf32>
    tpu.vector_store %arg7[%c0_21, %c0_22], %36 {strides = array<i32>} : memref<8x128xf32, #tpu.memory_space<vmem>>, vector<8x128xf32>,
    return
  }
  func.func @transform_0(%arg0: i32) -> (i32, i32) {
    %c0_i32 = arith.constant 0 : i32
    %c0_i32_0 = arith.constant 0 : i32
    return %arg0, %c0_i32 : i32, i32
  }
  func.func @transform_1(%arg0: i32) -> (i32, i32) {
    %c0_i32 = arith.constant 0 : i32
    %c0_i32_0 = arith.constant 0 : i32
    %c0_i32_1 = arith.constant 0 : i32
    return %c0_i32, %c0_i32_0 : i32, i32
  }
  func.func @transform_2(%arg0: i32) -> (i32, i32) {
    %c0_i32 = arith.constant 0 : i32
    %c0_i32_0 = arith.constant 0 : i32
    %c0_i32_1 = arith.constant 0 : i32
    return %c0_i32, %c0_i32_0 : i32, i32
  }
  func.func @transform_3(%arg0: i32) -> (i32, i32) {
    %c0_i32 = arith.constant 0 : i32
    %c0_i32_0 = arith.constant 0 : i32
    %c0_i32_1 = arith.constant 0 : i32
    return %c0_i32, %c0_i32_0 : i32, i32
  }
  func.func @transform_4(%arg0: i32) -> (i32, i32) {
    %c0_i32 = arith.constant 0 : i32
    %c0_i32_0 = arith.constant 0 : i32
    %c0_i32_1 = arith.constant 0 : i32
    return %c0_i32, %c0_i32_0 : i32, i32
  }
  func.func @transform_5(%arg0: i32) -> (i32, i32) {
    %c0_i32 = arith.constant 0 : i32
    %c0_i32_0 = arith.constant 0 : i32
    %c0_i32_1 = arith.constant 0 : i32
    return %c0_i32, %c0_i32_0 : i32, i32
  }
  func.func @transform_6(%arg0: i32) -> (i32, i32) {
    %c0_i32 = arith.constant 0 : i32
    %c0_i32_0 = arith.constant 0 : i32
    return %arg0, %c0_i32 : i32, i32
  }
}

</mosaic_0001>

<bundles_post_ra>
// kernel: mtl_forward.1
= control target key start
LH: loop header
LB: loop body
LE: loop exit
PB: predicated region body
PF: predicated region fallthrough
CT: control target
= control target key end

     0   :  { %vm31_vm0 = vcmask 130048   ;;  %v96_v51 = vlaneseq  ;;  %s391_s1 = inlined_call_operand.vmem [shape: f32[16,128], index: 1, kind: input, shape index: {}]   ;;  %s392_s0 = inlined_call_operand.vmem [shape: f32[8,16], index: 0, kind: input, shape index: {}]   ;;  %s393_s2 = inlined_call_operand.vmem [shape: f32[128,128], index: 2, kind: input, shape index: {}]   ;;  %s394_s5 = inlined_call_operand.vmem [shape: f32[8,128], index: 5, kind: input, shape index: {}]   ;;  %s395_s3 = inlined_call_operand.vmem [shape: f32[128,128], index: 3, kind: input, shape index: {}]   ;;  %s396_s4 = inlined_call_operand.vmem [shape: f32[128,128], index: 4, kind: input, shape index: {}]   ;;  %s397_s6 = inlined_call_operand.vmem [shape: f32[8,128], index: 6, kind: output, shape index: {}]  }
   0x1   :  { %v29_v0 = vld [vmem:[%s391_s1 + $0x8] sm:$0xff]  ;;  %v28_v1 = vld [vmem:[%s391_s1] sm:$0xff]  ;;  %v73_v3 = vld [vmem:[%s393_s2 + $0x78] sm:$0xff] }
   0x2   :  { %49 = vmatpush.msra.mxu0 %v29_v0  ;;  %v23_v2 = vld [vmem:[%s392_s0] sm:$0xff]  ;;  %v72_v4 = vld [vmem:[%s393_s2 + $0x70] sm:$0xff]  ;;  %75 = vmatpush.msra.mxu1 %v73_v3  ;;  %v71_v5 = vld [vmem:[%s393_s2 + $0x68] sm:$0xff]  ;;  %v97_v55 = vand.u32 127, %v96_v51 }
   0x3   :  { %v70_v6 = vld [vmem:[%s393_s2 + $0x60] sm:$0xff]  ;;  %v69_v7 = vld [vmem:[%s393_s2 + $0x58] sm:$0xff]  ;;  %v68_v8 = vld [vmem:[%s393_s2 + $0x50] sm:$0xff] }
   0x4   :  { %50 = vmatpush.msra.mxu0 %v28_v1  ;;  %76 = vmatpush.msra.mxu1 %v72_v4  ;;  %v67_v9 = vld [vmem:[%s393_s2 + $0x48] sm:$0xff]  ;;  %v66_v10 = vld [vmem:[%s393_s2 + $0x40] sm:$0xff]  ;;  %v65_v11 = vld [vmem:[%s393_s2 + $0x38] sm:$0xff]  ;;  %vm98_vm1 = vcmp.lt.s32.totalorder %v97_v55, 32 }
   0x5   :  { %183 = vmatmul.msk.f32.vlgmr.msra.gmra.mxu0 %vm31_vm0, %v23_v2  ;;  %v64_v12 = vld [vmem:[%s393_s2 + $0x30] sm:$0xff]  ;;  %v63_v13 = vld [vmem:[%s393_s2 + $0x28] sm:$0xff]  ;;  %v62_v14 = vld [vmem:[%s393_s2 + $0x20] sm:$0xff] }
   0x6   :  { %77 = vmatpush.msra.mxu1 %v71_v5  ;;  %v61_v15 = vld [vmem:[%s393_s2 + $0x18] sm:$0xff]  ;;  %v60_v16 = vld [vmem:[%s393_s2 + $0x10] sm:$0xff]  ;;  %v59_v17 = vld [vmem:[%s393_s2 + $0x8] sm:$0xff] }
   0x7   :  { %v58_v18 = vld [vmem:[%s393_s2] sm:$0xff]  ;;  %v118_v19 = vld [vmem:[%s395_s3 + $0x78] sm:$0xff]  ;;  %v117_v20 = vld [vmem:[%s395_s3 + $0x70] sm:$0xff] }
   0x8   :  { %78 = vmatpush.msra.mxu1 %v70_v6  ;;  %120 = vmatpush.msra.mxu2 %v118_v19  ;;  %v116_v21 = vld [vmem:[%s395_s3 + $0x68] sm:$0xff]  ;;  %v115_v22 = vld [vmem:[%s395_s3 + $0x60] sm:$0xff]  ;;  %v114_v23 = vld [vmem:[%s395_s3 + $0x58] sm:$0xff] }
   0x9   :  { %v113_v24 = vld [vmem:[%s395_s3 + $0x50] sm:$0xff]  ;;  %v112_v25 = vld [vmem:[%s395_s3 + $0x48] sm:$0xff]  ;;  %v111_v26 = vld [vmem:[%s395_s3 + $0x40] sm:$0xff] }
   0xa   :  { %79 = vmatpush.msra.mxu1 %v69_v7  ;;  %121 = vmatpush.msra.mxu2 %v117_v20  ;;  %v110_v27 = vld [vmem:[%s395_s3 + $0x38] sm:$0xff]  ;;  %v109_v28 = vld [vmem:[%s395_s3 + $0x30] sm:$0xff]  ;;  %v108_v29 = vld [vmem:[%s395_s3 + $0x28] sm:$0xff] }
   0xb   :  { %v184_v30 = vld [vmem:[%s394_s5] ss:$0 sm:$0xff]  ;;  %v106_v37 = vld [vmem:[%s395_s3 + $0x18] sm:$0xff]  ;;  %v105_v38 = vld [vmem:[%s395_s3 + $0x10] sm:$0xff] }
   0xc   :  { %80 = vmatpush.msra.mxu1 %v68_v8  ;;  %122 = vmatpush.msra.mxu2 %v116_v21  ;;  %v107_v31 = vld [vmem:[%s395_s3 + $0x20] sm:$0xff]  ;;  %v104_v39 = vld [vmem:[%s395_s3 + $0x8] sm:$0xff]  ;;  %v156_v41 = vld [vmem:[%s396_s4 + $0x78] sm:$0xff] }
   0xd   :  { %v103_v40 = vld [vmem:[%s395_s3] sm:$0xff]  ;;  %v155_v42 = vld [vmem:[%s396_s4 + $0x70] sm:$0xff]  ;;  %158 = vmatpush.msra.mxu3 %v156_v41  ;;  %v154_v43 = vld [vmem:[%s396_s4 + $0x68] sm:$0xff] }
   0xe   :  { %81 = vmatpush.msra.mxu1 %v67_v9  ;;  %123 = vmatpush.msra.mxu2 %v115_v22  ;;  %v153_v44 = vld [vmem:[%s396_s4 + $0x60] sm:$0xff]  ;;  %v152_v45 = vld [vmem:[%s396_s4 + $0x58] sm:$0xff]  ;;  %v151_v46 = vld [vmem:[%s396_s4 + $0x50] sm:$0xff] }
   0xf   :  { %159 = vmatpush.msra.mxu3 %v155_v42  ;;  %v150_v47 = vld [vmem:[%s396_s4 + $0x48] sm:$0xff]  ;;  %v149_v48 = vld [vmem:[%s396_s4 + $0x40] sm:$0xff]  ;;  %v148_v49 = vld [vmem:[%s396_s4 + $0x38] sm:$0xff] }
  0x10   :  { %82 = vmatpush.msra.mxu1 %v66_v10  ;;  %124 = vmatpush.msra.mxu2 %v114_v23  ;;  %v147_v50 = vld [vmem:[%s396_s4 + $0x30] sm:$0xff]  ;;  %v146_v52 = vld [vmem:[%s396_s4 + $0x28] sm:$0xff]  ;;  %v145_v53 = vld [vmem:[%s396_s4 + $0x20] sm:$0xff] }
  0x11   :  { %160 = vmatpush.msra.mxu3 %v154_v43  ;;  %v185_v54 = vld [vmem:[%s394_s5 + $0x1] ss:$0 sm:$0xff]  ;;  %v144_v56 = vld [vmem:[%s396_s4 + $0x18] sm:$0xff]  ;;  %v143_v62 = vld [vmem:[%s396_s4 + $0x10] sm:$0xff] }
  0x12   :  { %83 = vmatpush.msra.mxu1 %v65_v11  ;;  %125 = vmatpush.msra.mxu2 %v113_v24  ;;  %v142_v63 = vld [vmem:[%s396_s4 + $0x8] sm:$0xff]  ;;  %v141_v0 = vld [vmem:[%s396_s4] sm:$0xff] }
  0x13   :  { %161 = vmatpush.msra.mxu3 %v153_v44  ;;  %v186_v1 = vld [vmem:[%s394_s5 + $0x2] ss:$0 sm:$0xff]  ;;  %v187_v5 = vld [vmem:[%s394_s5 + $0x3] ss:$0 sm:$0xff] }
  0x14   :  { %84 = vmatpush.msra.mxu1 %v64_v12  ;;  %126 = vmatpush.msra.mxu2 %v112_v25 }
  0x15   :  { %162 = vmatpush.msra.mxu3 %v152_v45 }
  0x16   :  { %85 = vmatpush.msra.mxu1 %v63_v13  ;;  %127 = vmatpush.msra.mxu2 %v111_v26 }
  0x17   :  { %163 = vmatpush.msra.mxu3 %v151_v46 }
  0x18   :  { %86 = vmatpush.msra.mxu1 %v62_v14  ;;  %128 = vmatpush.msra.mxu2 %v110_v27 }
  0x19   :  { %164 = vmatpush.msra.mxu3 %v150_v47 }
  0x1a   :  { %87 = vmatpush.msra.mxu1 %v61_v15  ;;  %129 = vmatpush.msra.mxu2 %v109_v28 }
  0x1b   :  { %165 = vmatpush.msra.mxu3 %v149_v48 }
  0x1c   :  { %88 = vmatpush.msra.mxu1 %v60_v16  ;;  %130 = vmatpush.msra.mxu2 %v108_v29 }
  0x1d   :  { %166 = vmatpush.msra.mxu3 %v148_v49 }
  0x1e   :  { %89 = vmatpush.msra.mxu1 %v59_v17  ;;  %131 = vmatpush.msra.mxu2 %v107_v31 }
  0x1f   :  { %167 = vmatpush.msra.mxu3 %v147_v50 }
  0x20   :  { %90 = vmatpush.msra.mxu1 %v58_v18  ;;  %132 = vmatpush.msra.mxu2 %v106_v37 }
  0x21   :  { %168 = vmatpush.msra.mxu3 %v146_v52 }
  0x22   :  { %133 = vmatpush.msra.mxu2 %v105_v38 }
  0x23   :  { %169 = vmatpush.msra.mxu3 %v145_v53 }
  0x24   :  { %134 = vmatpush.msra.mxu2 %v104_v39 }
  0x25   :  { %170 = vmatpush.msra.mxu3 %v144_v56 }
  0x26   :  { %135 = vmatpush.msra.mxu2 %v103_v40 }
  0x27   :  { %171 = vmatpush.msra.mxu3 %v143_v62 }
  0x29   :  { %172 = vmatpush.msra.mxu3 %v142_v63 }
  0x2b   :  { %173 = vmatpush.msra.mxu3 %v141_v0 }
  0x82   :  { %v52_v32 = vpop.f32.mrf.mxu0 }
  0x83   :  { %v53_v33 = vadd.f32 %v184_v30, %v52_v32 }
  0x85   :  { %v55_v34 = vmax.f32 %v53_v33, 0.0 }
  0x87   :  { %v56_v35 = vmul.f32 %v55_v34, %v55_v34 }
  0x89   :  { %v57_v36 = vmul.f32 %v56_v35, %v56_v35 }
  0x8b   :  { %91 = vmatmul.f32.vlgmr.msra.gmra.mxu1 %v57_v36 }
 0x108   :  { %v92_v57 = vpop.f32.mrf.mxu1 }
 0x109   :  { %v93_v58 = vadd.f32 %v185_v54, %v92_v57 }
 0x10b   :  { %v95_v59 = vmax.f32 %v93_v58, 0.0 }
 0x10d   :  { %v101_v60 = vsel %vm98_vm1, %v95_v59, 1.0 }
 0x10e   :  { %v102_v61 = vmul.f32 %v101_v60, %v95_v59 }
 0x110   :  { %136 = vmatmul.f32.vlgmr.msra.gmra.mxu2 %v102_v61 }
 0x193   :  { %v137_v2 = vpop.f32.mrf.mxu2 }
 0x194   :  { %v138_v3 = vadd.f32 %v186_v1, %v137_v2 }
 0x196   :  { %v140_v4 = vmax.f32 %v138_v3, 0.0 }
 0x198   :  { %174 = vmatmul.f32.vlgmr.msra.gmra.mxu3 %v140_v4 }
 0x21b   :  { %v175_v6 = vpop.f32.mrf.mxu3 }
 0x21c   :  { %v176_v7 = vadd.f32 %v187_v5, %v175_v6 }
 0x21e   :  { %178 = vst [vmem:[%s397_s6] sm:$0xff] %v176_v7 }

</bundles_post_ra>
